<compile_context>
chip_gen: v7x
topology: tpu7x:2x2x1
jax: 0.10.0
libtpu: 0.0.40
codegen_flags: <defaults>
</compile_context>

<pallas_src>
import functools
import math

import jax
import jax.numpy as jnp
import numpy as np
from jax import lax
from jax.experimental import pallas as pl
from jax.experimental.pallas import tpu as pltpu

# Fixed Sobel weights (identical to the PyTorch module's constants).
KERNEL_X = ((1.0, 0.0, -1.0),
            (2.0, 0.0, -2.0),
            (1.0, 0.0, -1.0))
KERNEL_Y = ((1.0, 2.0, 1.0),
            (0.0, 0.0, 0.0),
            (-1.0, -2.0, -1.0))

C_OUT = 3


def _sobel_kernel(*refs, C, TH, W, k, sub, use_halo):
    """Separable 3x3 Sobel on the channel-summed plane, in folded layout.

    Folded layout: each folded row packs `k` consecutive image rows along the
    lane axis (lane width Wf = k*W), so original pixel (y, x) lives at folded
    row y // k, lane (y % k) * W + x.

    refs = (x_ref[, top_ref, bot_ref], gx_ref, gy_ref)
      x_ref   : (1, C, TH, Wf)   current folded row tile
      top_ref : (1, C, sub, Wf)  slab whose LAST row is the folded row above
      bot_ref : (1, C, sub, Wf)  slab whose FIRST row is the folded row below
      gx_ref, gy_ref : (1, 3, TH, Wf)
    """
    Wf = k * W
    if use_halo:
        x_ref, top_ref, bot_ref, gx_ref, gy_ref = refs
    else:
        x_ref, gx_ref, gy_ref = refs

    f32 = jnp.float32
    h = pl.program_id(1)
    n_h = pl.num_programs(1)

    # Channel sum once per tile (weights repeat across input channels).
    s = x_ref[0, 0, :, :].astype(f32)
    for c in range(1, C):
        s = s + x_ref[0, c, :, :].astype(f32)

    # Folded halo rows (channel-summed), zeroed at the image top/bottom so
    # they double as the conv's zero padding.
    if use_halo:
        s_top = top_ref[0, 0, sub - 1:sub, :].astype(f32)
        s_bot = bot_ref[0, 0, 0:1, :].astype(f32)
        for c in range(1, C):
            s_top = s_top + top_ref[0, c, sub - 1:sub, :].astype(f32)
            s_bot = s_bot + bot_ref[0, c, 0:1, :].astype(f32)
        s_top = jnp.where(h > 0, s_top, 0.0)
        s_bot = jnp.where(h < n_h - 1, s_bot, 0.0)
    else:
        s_top = jnp.zeros((1, Wf), f32)
        s_bot = jnp.zeros((1, Wf), f32)

    # Border masks: hoisted, computed once, kept low-rank.
    row = lax.broadcasted_iota(jnp.int32, (TH, 1), 0)
    lane = lax.broadcasted_iota(jnp.int32, (1, Wf), 1)
    row_first = row == 0
    row_last = row == TH - 1
    if k > 1:
        # Original-image column == 0 / W-1 inside every folded chunk (built by
        # k static comparisons; avoids vector integer mod).
        col_first = lane == 0
        col_last = lane == W - 1
        for j in range(1, k):
            col_first = jnp.logical_or(col_first, lane == j * W)
            col_last = jnp.logical_or(col_last, lane == j * W + W - 1)
        chunk_first = lane < W               # lanes holding image row k*R
        chunk_last = lane >= (k - 1) * W     # lanes holding image row k*R+k-1
    else:
        col_first = lane == 0
        col_last = lane == Wf - 1

    # Previous / next folded row (sublane rolls; wrapped rows replaced by the
    # halo rows, which are zero at the image borders).
    if TH > 1:
        s_prev = jnp.where(row_first, s_top, pltpu.roll(s, 1, axis=0))
        s_next = jnp.where(row_last, s_bot, pltpu.roll(s, TH - 1, axis=0))
    else:
        s_prev = jnp.broadcast_to(s_top, (TH, Wf))
        s_next = jnp.broadcast_to(s_bot, (TH, Wf))

    # Vertical neighbors s(y-1, x) / s(y+1, x) in the folded layout: within a
    # folded row that is a lane shift by +/-W; across folded rows the value
    # comes from s_prev / s_next.  One select + one roll covers both cases.
    if k > 1:
        t_up = jnp.where(chunk_last, s_prev, s)
        t_dn = jnp.where(chunk_first, s_next, s)
        s_up = pltpu.roll(t_up, W, axis=1)        # s_up[p] = t_up[p - W]
        s_dn = pltpu.roll(t_dn, Wf - W, axis=1)   # s_dn[p] = t_dn[p + W]
    else:
        s_up = s_prev
        s_dn = s_next

    # Separable Sobel: vertical pass ...
    v_smooth = s_up + 2.0 * s + s_dn      # column kernel [1, 2, 1]   -> grad_x
    v_diff = s_up - s_dn                  # column kernel [1, 0, -1]  -> grad_y

    # ... then horizontal pass via lane rolls, zeroed at the image left/right
    # edges (the masks also kill the cross-chunk wrap in the folded layout).
    vs_l = jnp.where(col_first, 0.0, pltpu.roll(v_smooth, 1, axis=1))
    vs_r = jnp.where(col_last, 0.0, pltpu.roll(v_smooth, Wf - 1, axis=1))
    vd_l = jnp.where(col_first, 0.0, pltpu.roll(v_diff, 1, axis=1))
    vd_r = jnp.where(col_last, 0.0, pltpu.roll(v_diff, Wf - 1, axis=1))

    gx = (vs_l - vs_r).astype(gx_ref.dtype)
    gy = (vd_l + 2.0 * v_diff + vd_r).astype(gy_ref.dtype)

    # The 3 output channels are identical; store the single plane 3 times to
    # keep the module's (B, 3, H, W) interface.
    # TODO(synk): ~2/3 of the kernel's HBM bytes are this triplicated store;
    # drop it (or cast to bf16) if downstream ever tolerates it.
    for c in range(C_OUT):
        gx_ref[0, c, :, :] = gx
        gy_ref[0, c, :, :] = gy


def _device_kind():
    try:
        return jax.devices()[0].device_kind.lower()
    except Exception:
        return ""


def _vmem_limit_bytes(kind):
    if "v2" in kind or "v3" in kind:
        return 12 * 1024 * 1024
    if "v5" in kind or "v6" in kind:
        return 80 * 1024 * 1024      # 128 MiB physical VMEM on v5e/v6e
    return 48 * 1024 * 1024          # v7x: 64 MiB physical; safe default


def _fold_factor(H, W, sub, tile_rows):
    """Rows folded into the lane axis (Wf = k*W, a multiple of 128 when the
    shape allows).  Falls back to k=1 when H / tile_rows don't cooperate."""
    k = 128 // math.gcd(W, 128)
    while k > 1 and (H % k != 0 or (H // k) < sub):
        k //= 2
    if tile_rows is not None and tile_rows < H:
        while k > 1 and tile_rows % (sub * k) != 0:
            k //= 2
    return k


def _pick_tile(Hf, Wf, sub, vmem_limit, want_split):
    """Pick the folded-row tile height TH (multiple of `sub` when multi-tile)
    and the number of zero folded rows to pad so TH divides Hf + pad."""
    bytes_per_row = 112 * Wf          # ~28 live f32 planes (blocks + temps)
    cap = max(sub, (int(0.85 * vmem_limit) // bytes_per_row) // sub * sub)
    if Hf <= cap:
        if want_split and Hf % (2 * sub) == 0:
            return Hf // 2, 0         # >=2 row steps: keep both v7x TCs busy
        return Hf, 0                  # whole (folded) image in one row tile
    # Largest divisor of Hf that is a multiple of `sub` and fits the budget.
    best, d = 0, sub
    while d <= min(Hf, cap):
        if Hf % d == 0:
            best = d
        d += sub
    if best >= min(cap, 8 * sub):     # keep halo re-read overhead <= ~12.5%
        return best, 0
    # Awkward Hf: pad with zero rows below (zero rows keep the conv's
    # zero-padding semantics) instead of dropping to tiny tiles.
    return cap, (-Hf) % cap


def image_gradient_net(x, tile_rows=None):
    """Forward pass of ImageGradientNet. x: (B, 3, H, W) NCHW.
    Returns (grad_x, grad_y), each (B, 3, H, W) like the PyTorch module."""
    B, C, H, W = x.shape
    assert C == 3, "ImageGradientNet expects 3 input channels"

    itemsize = jnp.dtype(x.dtype).itemsize
    sub = max(8, 32 // max(itemsize, 1))   # sublane multiple: 8 f32 / 16 bf16 / 32 int8

    k = _fold_factor(H, W, sub, tile_rows)
    Hf, Wf = H // k, k * W
    xf = x.reshape(B, C, Hf, Wf)           # contiguous refold: no data movement

    kind = _device_kind()
    vmem_limit = _vmem_limit_bytes(kind)

    if tile_rows is not None:
        if H % tile_rows != 0 or tile_rows % k != 0:
            raise ValueError("tile_rows must evenly divide H")
        TH = tile_rows // k
        if H // tile_rows > 1 and TH % sub != 0:
            raise ValueError(f"multi-tile runs need tile_rows % {sub * k} == 0")
        pad = 0
    else:
        want_split = (B == 1) and ("v7" in kind)
        TH, pad = _pick_tile(Hf, Wf, sub, vmem_limit, want_split)

    if pad:
        xf = jnp.pad(xf, ((0, 0), (0, 0), (0, pad), (0, 0)))
        Hf += pad
    nH = Hf // TH
    use_halo = nH > 1   # single tile: the image borders are the only borders

    x_spec = pl.BlockSpec((1, C, TH, Wf), lambda b, h: (b, 0, h, 0))
    out_spec = pl.BlockSpec((1, C_OUT, TH, Wf), lambda b, h: (b, 0, h, 0))

    if use_halo:
        th_blocks = TH // sub
        n_blocks = Hf // sub
        # `sub`-row slab whose LAST row is the folded row just above the tile.
        top_spec = pl.BlockSpec(
            (1, C, sub, Wf),
            lambda b, h: (b, 0, jnp.maximum(h * th_blocks - 1, 0), 0))
        # `sub`-row slab whose FIRST row is the folded row just below the tile.
        bot_spec = pl.BlockSpec(
            (1, C, sub, Wf),
            lambda b, h: (b, 0, jnp.minimum((h + 1) * th_blocks, n_blocks - 1), 0))
        in_specs = [x_spec, top_spec, bot_spec]
        args = (xf, xf, xf)
    else:
        in_specs = [x_spec]
        args = (xf,)

    kernel = functools.partial(_sobel_kernel, C=C, TH=TH, W=W, k=k, sub=sub,
                               use_halo=use_halo)

    gxf, gyf = pl.pallas_call(
        kernel,
        out_shape=(
            jax.ShapeDtypeStruct((B, C_OUT, Hf, Wf), x.dtype),
            jax.ShapeDtypeStruct((B, C_OUT, Hf, Wf), x.dtype),
        ),
        grid_spec=pltpu.PrefetchScalarGridSpec(
            num_scalar_prefetch=0,
            grid=(B, nH),
            in_specs=in_specs,
            out_specs=[out_spec, out_spec],
        ),
        compiler_params=pltpu.CompilerParams(
            dimension_semantics=("parallel", "parallel"),
            vmem_limit_bytes=vmem_limit),
    )(*args)

    grad_x = gxf.reshape(B, C_OUT, Hf * k, W)
    grad_y = gyf.reshape(B, C_OUT, Hf * k, W)
    if pad:
        grad_x = grad_x[:, :, :H, :]
        grad_y = grad_y[:, :, :H, :]
    return grad_x, grad_y


def _reference(x):
    """Pure-JAX reference using lax.conv, identical to the PyTorch module."""
    block_x = np.array(KERNEL_X, np.float32)
    block_y = np.array(KERNEL_Y, np.float32)
    w_x = np.broadcast_to(block_x, (3, 3, 3, 3)).copy()  # (O, I, kH, kW)
    w_y = np.broadcast_to(block_y, (3, 3, 3, 3)).copy()
    dn = ("NCHW", "OIHW", "NCHW")
    gx = lax.conv_general_dilated(x, jnp.asarray(w_x), (1, 1), "SAME",
                                  dimension_numbers=dn)
    gy = lax.conv_general_dilated(x, jnp.asarray(w_y), (1, 1), "SAME",
                                  dimension_numbers=dn)
    return gx, gy


if __name__ == "__main__":
    def check(x, tile_rows=None):
        gx, gy = image_gradient_net(x, tile_rows=tile_rows)
        jax.block_until_ready((gx, gy))
        gx_ref, gy_ref = _reference(x)
        np.testing.assert_allclose(np.asarray(gx), np.asarray(gx_ref),
                                   atol=1e-4, rtol=1e-4)
        np.testing.assert_allclose(np.asarray(gy), np.asarray(gy_ref),
                                   atol=1e-4, rtol=1e-4)

    # 1) Module-sized input: single row tile, folded lanes (k=2 -> Wf=32).
    check(jax.random.normal(jax.random.PRNGKey(0), (2, 3, 16, 16), dtype=jnp.float32))
    # 2) Explicit small row tiles: k=1 halo-slab path (narrow W).
    check(jax.random.normal(jax.random.PRNGKey(1), (2, 3, 32, 16), dtype=jnp.float32),
          tile_rows=8)
    # 3) Folded, fully lane-dense (k=8 -> Wf=128) multi-tile halo path.
    check(jax.random.normal(jax.random.PRNGKey(2), (1, 3, 128, 16), dtype=jnp.float32),
          tile_rows=64)
    # 4) Lane-dense W=128 (k=1) multi-tile halo path.
    check(jax.random.normal(jax.random.PRNGKey(3), (1, 3, 48, 128), dtype=jnp.float32),
          tile_rows=16)

    print("KERNEL_OK")
</pallas_src>

<mosaic_0001>
module attributes {stable_mosaic.version = 11 : i64} {
  func.func @_sobel_kernel(%arg0: i32, %arg1: i32, %arg2: memref<1x3x8x32xf32, #tpu.memory_space<vmem>>, %arg3: memref<1x3x8x32xf32, #tpu.memory_space<vmem>>, %arg4: memref<1x3x8x32xf32, #tpu.memory_space<vmem>>) attributes {dimension_semantics = [#tpu.dimension_semantics<parallel>, #tpu.dimension_semantics<parallel>], iteration_bounds = array<i64: 2, 1>, scalar_prefetch = 0 : i64, scratch_operands = 0 : i64, tpu.core_type = #tpu.core_type<tc>, window_params = [{transform_indices = @transform_0, window_bounds = array<i64: 1, 3, 8, 32>}, {transform_indices = @transform_1, window_bounds = array<i64: 1, 3, 8, 32>}, {transform_indices = @transform_2, window_bounds = array<i64: 1, 3, 8, 32>}]} {
    %c0 = arith.constant 0 : index
    %c0_0 = arith.constant 0 : index
    %c0_1 = arith.constant 0 : index
    %c0_2 = arith.constant 0 : index
    %0 = vector.load %arg2[%c0, %c0_0, %c0_1, %c0_2] : memref<1x3x8x32xf32, #tpu.memory_space<vmem>>, vector<1x1x8x32xf32>
    %1 = vector.shape_cast %0 : vector<1x1x8x32xf32> to vector<8x32xf32>
    %c0_3 = arith.constant 0 : index
    %c1 = arith.constant 1 : index
    %c0_4 = arith.constant 0 : index
    %c0_5 = arith.constant 0 : index
    %2 = vector.load %arg2[%c0_3, %c1, %c0_4, %c0_5] : memref<1x3x8x32xf32, #tpu.memory_space<vmem>>, vector<1x1x8x32xf32>
    %3 = vector.shape_cast %2 : vector<1x1x8x32xf32> to vector<8x32xf32>
    %4 = arith.addf %1, %3 : vector<8x32xf32>
    %c0_6 = arith.constant 0 : index
    %c2 = arith.constant 2 : index
    %c0_7 = arith.constant 0 : index
    %c0_8 = arith.constant 0 : index
    %5 = vector.load %arg2[%c0_6, %c2, %c0_7, %c0_8] : memref<1x3x8x32xf32, #tpu.memory_space<vmem>>, vector<1x1x8x32xf32>
    %6 = vector.shape_cast %5 : vector<1x1x8x32xf32> to vector<8x32xf32>
    %7 = arith.addf %4, %6 : vector<8x32xf32>
    %cst = arith.constant 0.000000e+00 : f32
    %8 = vector.broadcast %cst : f32 to vector<1x32xf32>
    %cst_9 = arith.constant 0.000000e+00 : f32
    %9 = vector.broadcast %cst_9 : f32 to vector<1x32xf32>
    %10 = tpu.iota {dimensions = array<i32: 0>} : vector<8x1xi32>
    %11 = tpu.iota {dimensions = array<i32: 1>} : vector<1x32xi32>
    %c0_i32 = arith.constant 0 : i32
    %12 = vector.broadcast %c0_i32 : i32 to vector<8x1xi32>
    %13 = arith.cmpi eq, %10, %12 : vector<8x1xi32>
    %c7_i32 = arith.constant 7 : i32
    %14 = vector.broadcast %c7_i32 : i32 to vector<8x1xi32>
    %15 = arith.cmpi eq, %10, %14 : vector<8x1xi32>
    %c0_i32_10 = arith.constant 0 : i32
    %16 = vector.broadcast %c0_i32_10 : i32 to vector<1x32xi32>
    %17 = arith.cmpi eq, %11, %16 : vector<1x32xi32>
    %c15_i32 = arith.constant 15 : i32
    %18 = vector.broadcast %c15_i32 : i32 to vector<1x32xi32>
    %19 = arith.cmpi eq, %11, %18 : vector<1x32xi32>
    %c16_i32 = arith.constant 16 : i32
    %20 = vector.broadcast %c16_i32 : i32 to vector<1x32xi32>
    %21 = arith.cmpi eq, %11, %20 : vector<1x32xi32>
    %22 = arith.ori %17, %21 : vector<1x32xi1>
    %c31_i32 = arith.constant 31 : i32
    %23 = vector.broadcast %c31_i32 : i32 to vector<1x32xi32>
    %24 = arith.cmpi eq, %11, %23 : vector<1x32xi32>
    %25 = arith.ori %19, %24 : vector<1x32xi1>
    %c16_i32_11 = arith.constant 16 : i32
    %26 = vector.broadcast %c16_i32_11 : i32 to vector<1x32xi32>
    %27 = arith.cmpi slt, %11, %26 : vector<1x32xi32>
    %c16_i32_12 = arith.constant 16 : i32
    %28 = vector.broadcast %c16_i32_12 : i32 to vector<1x32xi32>
    %29 = arith.cmpi sge, %11, %28 : vector<1x32xi32>
    %c1_i32 = arith.constant 1 : i32
    %30 = tpu.dynamic_rotate %7 by %c1_i32 dim 0 : vector<8x32xf32>, i32 -> vector<8x32xf32>
    %31 = vector.shape_cast %13 : vector<8x1xi1> to vector<8x1xi1>
    %32 = vector.broadcast %31 : vector<8x1xi1> to vector<8x32xi1>
    %33 = vector.shape_cast %8 : vector<1x32xf32> to vector<1x32xf32>
    %34 = vector.broadcast %33 : vector<1x32xf32> to vector<8x32xf32>
    %35 = arith.select %32, %34, %30 : vector<8x32xi1>, vector<8x32xf32>
    %c7_i32_13 = arith.constant 7 : i32
    %36 = tpu.dynamic_rotate %7 by %c7_i32_13 dim 0 : vector<8x32xf32>, i32 -> vector<8x32xf32>
    %37 = vector.shape_cast %15 : vector<8x1xi1> to vector<8x1xi1>
    %38 = vector.broadcast %37 : vector<8x1xi1> to vector<8x32xi1>
    %39 = vector.shape_cast %9 : vector<1x32xf32> to vector<1x32xf32>
    %40 = vector.broadcast %39 : vector<1x32xf32> to vector<8x32xf32>
    %41 = arith.select %38, %40, %36 : vector<8x32xi1>, vector<8x32xf32>
    %42 = vector.shape_cast %29 : vector<1x32xi1> to vector<1x32xi1>
    %43 = vector.broadcast %42 : vector<1x32xi1> to vector<8x32xi1>
    %44 = arith.select %43, %35, %7 : vector<8x32xi1>, vector<8x32xf32>
    %45 = vector.shape_cast %27 : vector<1x32xi1> to vector<1x32xi1>
    %46 = vector.broadcast %45 : vector<1x32xi1> to vector<8x32xi1>
    %47 = arith.select %46, %41, %7 : vector<8x32xi1>, vector<8x32xf32>
    %c16_i32_14 = arith.constant 16 : i32
    %48 = tpu.dynamic_rotate %44 by %c16_i32_14 dim 1 : vector<8x32xf32>, i32 -> vector<8x32xf32>
    %c16_i32_15 = arith.constant 16 : i32
    %49 = tpu.dynamic_rotate %47 by %c16_i32_15 dim 1 : vector<8x32xf32>, i32 -> vector<8x32xf32>
    %cst_16 = arith.constant 2.000000e+00 : f32
    %50 = vector.broadcast %cst_16 : f32 to vector<8x32xf32>
    %51 = arith.mulf %50, %7 : vector<8x32xf32>
    %52 = arith.addf %48, %51 : vector<8x32xf32>
    %53 = arith.addf %52, %49 : vector<8x32xf32>
    %54 = arith.subf %48, %49 : vector<8x32xf32>
    %c1_i32_17 = arith.constant 1 : i32
    %55 = tpu.dynamic_rotate %53 by %c1_i32_17 dim 1 : vector<8x32xf32>, i32 -> vector<8x32xf32>
    %cst_18 = arith.constant 0.000000e+00 : f32
    %56 = vector.shape_cast %22 : vector<1x32xi1> to vector<1x32xi1>
    %57 = vector.broadcast %56 : vector<1x32xi1> to vector<8x32xi1>
    %58 = vector.broadcast %cst_18 : f32 to vector<8x32xf32>
    %59 = arith.select %57, %58, %55 : vector<8x32xi1>, vector<8x32xf32>
    %c31_i32_19 = arith.constant 31 : i32
    %60 = tpu.dynamic_rotate %53 by %c31_i32_19 dim 1 : vector<8x32xf32>, i32 -> vector<8x32xf32>
    %cst_20 = arith.constant 0.000000e+00 : f32
    %61 = vector.shape_cast %25 : vector<1x32xi1> to vector<1x32xi1>
    %62 = vector.broadcast %61 : vector<1x32xi1> to vector<8x32xi1>
    %63 = vector.broadcast %cst_20 : f32 to vector<8x32xf32>
    %64 = arith.select %62, %63, %60 : vector<8x32xi1>, vector<8x32xf32>
    %c1_i32_21 = arith.constant 1 : i32
    %65 = tpu.dynamic_rotate %54 by %c1_i32_21 dim 1 : vector<8x32xf32>, i32 -> vector<8x32xf32>
    %cst_22 = arith.constant 0.000000e+00 : f32
    %66 = vector.shape_cast %22 : vector<1x32xi1> to vector<1x32xi1>
    %67 = vector.broadcast %66 : vector<1x32xi1> to vector<8x32xi1>
    %68 = vector.broadcast %cst_22 : f32 to vector<8x32xf32>
    %69 = arith.select %67, %68, %65 : vector<8x32xi1>, vector<8x32xf32>
    %c31_i32_23 = arith.constant 31 : i32
    %70 = tpu.dynamic_rotate %54 by %c31_i32_23 dim 1 : vector<8x32xf32>, i32 -> vector<8x32xf32>
    %cst_24 = arith.constant 0.000000e+00 : f32
    %71 = vector.shape_cast %25 : vector<1x32xi1> to vector<1x32xi1>
    %72 = vector.broadcast %71 : vector<1x32xi1> to vector<8x32xi1>
    %73 = vector.broadcast %cst_24 : f32 to vector<8x32xf32>
    %74 = arith.select %72, %73, %70 : vector<8x32xi1>, vector<8x32xf32>
    %75 = arith.subf %59, %64 : vector<8x32xf32>
    %cst_25 = arith.constant 2.000000e+00 : f32
    %76 = vector.broadcast %cst_25 : f32 to vector<8x32xf32>
    %77 = arith.mulf %76, %54 : vector<8x32xf32>
    %78 = arith.addf %69, %77 : vector<8x32xf32>
    %79 = arith.addf %78, %74 : vector<8x32xf32>
    %c0_26 = arith.constant 0 : index
    %c0_27 = arith.constant 0 : index
    %c0_28 = arith.constant 0 : index
    %c0_29 = arith.constant 0 : index
    %80 = vector.load %arg3[%c0_26, %c0_27, %c0_28, %c0_29] : memref<1x3x8x32xf32, #tpu.memory_space<vmem>>, vector<1x1x8x32xf32>
    %81 = vector.shape_cast %80 : vector<1x1x8x32xf32> to vector<8x32xf32>
    %82 = vector.shape_cast %75 : vector<8x32xf32> to vector<1x1x8x32xf32>
    tpu.vector_store %arg3[%c0_26, %c0_27, %c0_28, %c0_29], %82 {strides = array<i32>} : memref<1x3x8x32xf32, #tpu.memory_space<vmem>>, vector<1x1x8x32xf32>,
    %c0_30 = arith.constant 0 : index
    %c0_31 = arith.constant 0 : index
    %c0_32 = arith.constant 0 : index
    %c0_33 = arith.constant 0 : index
    %83 = vector.load %arg4[%c0_30, %c0_31, %c0_32, %c0_33] : memref<1x3x8x32xf32, #tpu.memory_space<vmem>>, vector<1x1x8x32xf32>
    %84 = vector.shape_cast %83 : vector<1x1x8x32xf32> to vector<8x32xf32>
    %85 = vector.shape_cast %79 : vector<8x32xf32> to vector<1x1x8x32xf32>
    tpu.vector_store %arg4[%c0_30, %c0_31, %c0_32, %c0_33], %85 {strides = array<i32>} : memref<1x3x8x32xf32, #tpu.memory_space<vmem>>, vector<1x1x8x32xf32>,
    %c0_34 = arith.constant 0 : index
    %c1_35 = arith.constant 1 : index
    %c0_36 = arith.constant 0 : index
    %c0_37 = arith.constant 0 : index
    %86 = vector.load %arg3[%c0_34, %c1_35, %c0_36, %c0_37] : memref<1x3x8x32xf32, #tpu.memory_space<vmem>>, vector<1x1x8x32xf32>
    %87 = vector.shape_cast %86 : vector<1x1x8x32xf32> to vector<8x32xf32>
    %88 = vector.shape_cast %75 : vector<8x32xf32> to vector<1x1x8x32xf32>
    tpu.vector_store %arg3[%c0_34, %c1_35, %c0_36, %c0_37], %88 {strides = array<i32>} : memref<1x3x8x32xf32, #tpu.memory_space<vmem>>, vector<1x1x8x32xf32>,
    %c0_38 = arith.constant 0 : index
    %c1_39 = arith.constant 1 : index
    %c0_40 = arith.constant 0 : index
    %c0_41 = arith.constant 0 : index
    %89 = vector.load %arg4[%c0_38, %c1_39, %c0_40, %c0_41] : memref<1x3x8x32xf32, #tpu.memory_space<vmem>>, vector<1x1x8x32xf32>
    %90 = vector.shape_cast %89 : vector<1x1x8x32xf32> to vector<8x32xf32>
    %91 = vector.shape_cast %79 : vector<8x32xf32> to vector<1x1x8x32xf32>
    tpu.vector_store %arg4[%c0_38, %c1_39, %c0_40, %c0_41], %91 {strides = array<i32>} : memref<1x3x8x32xf32, #tpu.memory_space<vmem>>, vector<1x1x8x32xf32>,
    %c0_42 = arith.constant 0 : index
    %c2_43 = arith.constant 2 : index
    %c0_44 = arith.constant 0 : index
    %c0_45 = arith.constant 0 : index
    %92 = vector.load %arg3[%c0_42, %c2_43, %c0_44, %c0_45] : memref<1x3x8x32xf32, #tpu.memory_space<vmem>>, vector<1x1x8x32xf32>
    %93 = vector.shape_cast %92 : vector<1x1x8x32xf32> to vector<8x32xf32>
    %94 = vector.shape_cast %75 : vector<8x32xf32> to vector<1x1x8x32xf32>
    tpu.vector_store %arg3[%c0_42, %c2_43, %c0_44, %c0_45], %94 {strides = array<i32>} : memref<1x3x8x32xf32, #tpu.memory_space<vmem>>, vector<1x1x8x32xf32>,
    %c0_46 = arith.constant 0 : index
    %c2_47 = arith.constant 2 : index
    %c0_48 = arith.constant 0 : index
    %c0_49 = arith.constant 0 : index
    %95 = vector.load %arg4[%c0_46, %c2_47, %c0_48, %c0_49] : memref<1x3x8x32xf32, #tpu.memory_space<vmem>>, vector<1x1x8x32xf32>
    %96 = vector.shape_cast %95 : vector<1x1x8x32xf32> to vector<8x32xf32>
    %97 = vector.shape_cast %79 : vector<8x32xf32> to vector<1x1x8x32xf32>
    tpu.vector_store %arg4[%c0_46, %c2_47, %c0_48, %c0_49], %97 {strides = array<i32>} : memref<1x3x8x32xf32, #tpu.memory_space<vmem>>, vector<1x1x8x32xf32>,
    return
  }
  func.func @transform_0(%arg0: i32, %arg1: i32) -> (i32, i32, i32, i32) {
    %c0_i32 = arith.constant 0 : i32
    %c0_i32_0 = arith.constant 0 : i32
    %c0_i32_1 = arith.constant 0 : i32
    return %arg0, %c0_i32, %arg1, %c0_i32_0 : i32, i32, i32, i32
  }
  func.func @transform_1(%arg0: i32, %arg1: i32) -> (i32, i32, i32, i32) {
    %c0_i32 = arith.constant 0 : i32
    %c0_i32_0 = arith.constant 0 : i32
    %c0_i32_1 = arith.constant 0 : i32
    return %arg0, %c0_i32, %arg1, %c0_i32_0 : i32, i32, i32, i32
  }
  func.func @transform_2(%arg0: i32, %arg1: i32) -> (i32, i32, i32, i32) {
    %c0_i32 = arith.constant 0 : i32
    %c0_i32_0 = arith.constant 0 : i32
    %c0_i32_1 = arith.constant 0 : i32
    return %arg0, %c0_i32, %arg1, %c0_i32_0 : i32, i32, i32, i32
  }
}

</mosaic_0001>

<bundles_post_ra>
// kernel: tpu_custom_call.1
= control target key start
LH: loop header
LB: loop body
LE: loop exit
PB: predicated region body
PF: predicated region fallthrough
CT: control target
= control target key end

     0   :  { %8 = vsyncpa [#allocation3], 0  ;;  %s1000_s0 = inlined_call_operand.hbm [shape: f32[2,3,8,32], index: 0, kind: input, shape index: {}]   ;;  %s1001_s1 = inlined_call_operand.hbm [shape: f32[2,3,8,32], index: 1, kind: output, shape index: {0}]   ;;  %s1002_s2 = inlined_call_operand.hbm [shape: f32[2,3,8,32], index: 2, kind: output, shape index: {1}]  }
   0x1   :  { %10 = vsyncpa [#allocation3 + $0x1], 0 }
   0x2   :  { %11 = vsyncpa [#allocation4], 0 }
   0x3   :  { %13 = vsyncpa [#allocation4 + $0x1], 0 }
   0x4   :  { %14 = vsyncpa [#allocation7], 0 }
   0x5   :  { %16 = vsyncpa [#allocation7 + $0x1], 0  ;;  %s735_s9 = smov 0   ;;  %s737_s10 = smov 0  }
   0x6   :  { %s739_s11 = smov 0   ;;  %s741_s12 = smov 0  }
   0x7   :  { %s743_s13 = smov 0   ;;  %s745_s14 = smov 0  }
   0x8 LB: > { %s465_s15 = sadd.s32 4294967295, %s706_s14   ;;  %s466_s16 = sadd.s32 4294967294, %s706_s14   ;;  %s706_s14 = sphi %s745_s14, %s22_s14   ;;  %s702_s13 = sphi %s743_s13, %s1019_s13   ;;  %s698_s12 = sphi %s741_s12, %s1018_s12   ;;  %s694_s11 = sphi %s739_s11, %s1017_s11   ;;  %s690_s10 = sphi %s737_s10, %s1016_s10   ;;  %s686_s9 = sphi %s735_s9, %s1015_s9  }
   0x9   : > { %s34_s17 = sadd.s32 1, %s702_s13  ;;  %s43_s18 = sadd.s32 1, %s694_s11 }
   0xa   : > { %p36_p0 = scmp.ge.s32.totalorder %s34_s17, 2  ;;  %p50_p1 = scmp.ne.s32.totalorder %s694_s11, %s690_s10 }
   0xb   : > { %p51_p2 = scmp.eq.s32.totalorder %s706_s14, 0  ;;  %p56_p3 = scmp.ne.s32.totalorder %s690_s10, %s686_s9 }
   0xc   : > { %s1021_s17 = smov (%p36_p0, %s34_s17), 0  ;;  %p57_p5 = scmp.eq.s32.totalorder %s465_s15, 0 }
   0xd   : > { %p776_p4 = por %p51_p2, %p50_p1  ;;  %s38_s20 = ssub.s32 %s702_s13, %s1021_s17 }
   0xe   : > { %p82_p6 = scmp.eq.s32.totalorder %s465_s15, 1  ;;  %p41_p7 = scmp.eq.s32.totalorder %s38_s20, 0 }
   0xf   : > { %p782_p8 = por %p57_p5, %p56_p3  ;;  %p88_p10 = scmp.eq.s32.totalorder %s466_s16, 1 }
  0x10   : > { %p786_p9 = por %p82_p6, %p50_p1  ;;  %p503_p13 = scmp.lt.s32.totalorder %s706_s14, 2 }
  0x11   : > { %s791_s23 = scalar_select %p41_p7, %s694_s11, %s43_s18  }
  0x12   : > { %s1006_s22 = scalar_select %p786_p9, 1, 0 }
  0x13   : > { %p793_p11 = por %p88_p10, %p56_p3  ;;  %s136_s25 = sand.u32 1, %s694_s11  }
  0x14   : > { %s481_s26 = smul.u32 24, %s136_s25  ;;  %p803_p0 = pnand %p503_p13, %p776_p4 }
  0x15   : > { %s1007_s24 = scalar_select %p793_p11, 1, 0 }
  0x16   : > { %s482_s27 = smul.u32 384, %s702_s13  ;;  %s140_s4 = scalar_lea.vmem [#allocation2], %s481_s26 }
  0x17   : > { %s148_s5 = sshll.u32 %s140_s4, 4  ;;  %s815_s6 = scalar_lea.sflag [#allocation3], %s136_s25  ;;  %s812_s5 = int_to_ptr.vmem [resolvable:$true] %s148_s5 }
  0x18   : > { %s810_s3 = scalar_lea.hbm %s1000_s0, %s482_s27  ;;  %p564_p3 = pneg %p803_p0 }
  0x19   : > { %s562_s7 = scalar_lea.hbm %s810_s3, 384  ;;  %s567_s16 = scalar_lea.hbm %s1000_s0, 768 }
  0x1a   : > { %p563_p2 = scmp.ne.s32.totalorder %s810_s3, %s562_s7  ;;  %p568_p6 = scmp.lt.u32.totalorder %s810_s3, %s1000_s0 }
  0x1b   : > { %p569_p7 = scmp.lt.u32.totalorder %s567_s16, %s562_s7  ;;  %p571_p13 = scmp.lt.u32.totalorder %s562_s7, %s810_s3 }
  0x1c   : > { %p565_p4 = pnand %p564_p3, %p563_p2 }
  0x1d   : > { %p570_p10 = por %p569_p7, %p568_p6 }
  0x1e   : > { %p566_p5 = pneg %p565_p4 }
  0x1f   : > { %p572_p12 = por %p571_p13, %p570_p10 }
  0x21   : > { %p573_p1 = pnand %p572_p12, %p566_p5 }
  0x23   : > { %576 = shalt.err (!%p573_p1)
}
  0x24   : > { %s577_s20 = scalar_lea.vmem %s812_s5, 384  ;;  %s708_s25 = smov [#allocation2]  }
  0x25   : > { %p578_p2 = scmp.ne.s32.totalorder %s812_s5, %s577_s20  ;;  %s582_s26 = sshll.u32 %s708_s25, 4  ;;  %s583_s26 = int_to_ptr.vmem [resolvable:$false] %s582_s26 }
  0x26   : > { %s584_s27 = scalar_lea.vmem %s583_s26, 768  ;;  %p585_p9 = scmp.lt.s32.totalorder %s812_s5, %s583_s26 }
  0x27   : > { %p580_p4 = pnand %p578_p2, %p564_p3  ;;  %p586_p6 = scmp.lt.s32.totalorder %s584_s27, %s577_s20 }
  0x29   : > { %p581_p11 = pneg %p580_p4  ;;  %p587_p7 = por %p586_p6, %p585_p9 }
  0x2b   : > { %p588_p10 = pnand %p587_p7, %p581_p11 }
  0x2d   : > { %591 = shalt.err (!%p588_p10)
}
  0x2e   : > { %s709_s29 = smov 128   ;;  %s710_s30 = smov 8  }
  0x2f   : > { %495 = dma.hbm_to_vmem [thread:$0]  (!%p803_p0), %s810_s3, 384, %s812_s5, %s815_s6, %s709_s29, %s709_s29, %s710_s30  }
  0x30   : > { %p156_p12 = scmp.lt.s32.totalorder %s706_s14, 3  ;;  %p1009_p1 = scmp.ge.s32.totalorder %s706_s14, 1 }
  0x32   : > { %p157_p3 = pnand %p1009_p1, %p156_p12 }
  0x33   : > { %s847_s4 = sand.u32 (!%p157_p3), 1, %s690_s10  }
  0x34   : > { %160 = sbr.rel (%p157_p3) target bundleno = 815 (0x32f), region = 24  ;;  %s163_s8 = scalar_lea.sflag (!%p157_p3), [#allocation3], %s847_s4 }
  0x35   : > { %s850_s7 = smul.u32 (!%p157_p3), 24, %s847_s4 }
  0x37   : > { %s166_s15 = scalar_lea.vmem (!%p157_p3), [#allocation2], %s850_s7 }
  0x3b   : > { %673 = dma.done.wait (%p782_p8), %s163_s8, 384  }
  0x3c   : > { %675 = vsyncadd (%p782_p8), %s163_s8, 4294966912  ;;  %v199_v0 = vlaneseq  ;;  %v192_v1 = vld [vmem:[%s166_s15] sm:$0xff]  ;;  %v471_v2 = vld [vmem:[%s166_s15 + $0x8] sm:$0xff]  ;;  %s711_s21 = smov 32   ;;  %s712_s28 = smov 16   ;;  %vm227_vm4 = vcmask 1047808  }
  0x3d   : > { %v472_v3 = vld [vmem:[%s166_s15 + $0x10] sm:$0xff]  ;;  %v195_v5 = vadd.f32 %v471_v2, %v192_v1  ;;  %s713_s3 = smov 112   ;;  %s714_s5 = smov 97   ;;  %vm298_vm11 = vcmask 261120  }
  0x3e   : > { %v200_v4 = vshrl.u32 %v199_v0, 7  ;;  %v858_v6 = vand.u32 127, %v199_v0  ;;  %s715_s6 = smov 127   ;;  %s184_s16 = scalar_lea.vmem [#allocation5], %s850_s7 }
  0x3f   : > { %v198_v7 = vadd.f32 %v472_v3, %v195_v5  ;;  %s329_s18 = sshll.u32 %s184_s16, 4  ;;  %s484_s19 = smul.u32 384, %s698_s12  ;;  %s888_s18 = int_to_ptr.vmem [resolvable:$true] %s329_s18 }
  0x40   : > { %vm203_vm0 = vcmp.eq.s32.totalorder %v200_v4, 0  ;;  %vm204_vm1 = vcmp.eq.s32.totalorder %v200_v4, 7  ;;  %vm212_vm2 = vcmp.ge.s32.totalorder %v858_v6, 16  ;;  %vm211_vm3 = vcmp.lt.s32.totalorder %v858_v6, 16  ;;  %s891_s20 = scalar_lea.vmem [#allocation6], %s850_s7  ;;  %s310_s30 = scalar_lea.sflag [#allocation4], %s847_s4 }
  0x41   : > { %v213_v8 = vrot.slane %v198_v7, 7  ;;  %v217_v9 = vrot.slane %v198_v7, 1  ;;  %v240_v14 = vmul.f32 2.0, %v198_v7  ;;  %vm205_vm5 = vcmp.eq.s32.totalorder %v858_v6, 0  ;;  %s346_s25 = sshll.u32 %s891_s20, 4  ;;  %s901_s29 = scalar_lea.hbm %s1001_s1, %s484_s19  ;;  %s906_s25 = int_to_ptr.vmem [resolvable:$true] %s346_s25 }
  0x42   : > { %vm207_vm6 = vcmp.eq.s32.totalorder %v858_v6, 16  ;;  %vm206_vm7 = vcmp.eq.s32.totalorder %v858_v6, 15  ;;  %vm209_vm8 = vcmp.eq.s32.totalorder %v858_v6, 31  ;;  %s592_s7 = scalar_lea.vmem %s888_s18, 384  ;;  %p1012_p9 = scmp.ne.s32.totalorder %s1006_s22, 0 }
  0x43   : > { %v216_v10 = vsel %vm203_vm0, 0.0, %v213_v8  ;;  %v220_v11 = vsel %vm204_vm1, 0.0, %v217_v9  ;;  %vm208_vm9 = vmor %vm205_vm5, %vm207_vm6  ;;  %p593_p8 = scmp.ne.s32.totalorder %s888_s18, %s592_s7  ;;  %s716_s8 = smov [#allocation5]  }
  0x44   : > { %v223_v12 = vsel %vm212_vm2, %v216_v10, %v198_v7  ;;  %v226_v13 = vsel %vm211_vm3, %v220_v11, %v198_v7  ;;  %vm884_vm10 = vmor %vm206_vm7, %vm209_vm8  ;;  %s596_s15 = sshll.u32 %s716_s8, 4  ;;  %s597_s15 = int_to_ptr.vmem [resolvable:$false] %s596_s15 }
  0x45   : > { %228 = vrot.lane.b32.xlu0 %v223_v12, %s711_s21  ;;  %p594_p11 = pnand %p593_p8, %p1012_p9  ;;  %p599_p5 = scmp.lt.s32.totalorder %s888_s18, %s597_s15 }
  0x47   : > { %p595_p0 = pneg %p594_p11 }
  0x49   : > { %234 = vrot.lane.b32.xlu0 %v226_v13, %s711_s21 }
  0x4d   : > { %242 = vrot.lane.b32.xlu0 %v240_v14, %s712_s28 }
  0xb7   : > { %v229_v15 = vpop.permute.xlu0 %228 }
  0xb8   : > { %v230_v16 = vsel %vm227_vm4, %v229_v15, %v223_v12 }
  0xb9   : > { %231 = vrot.lane.b32.xlu1 %v230_v16, %s711_s21 }
  0xbb   : > { %v235_v17 = vpop.permute.xlu0 %234 }
  0xbc   : > { %v236_v18 = vsel %vm227_vm4, %v235_v17, %v226_v13 }
  0xbd   : > { %237 = vrot.lane.b32.xlu1 %v236_v18, %s711_s21 }
  0xbf   : > { %v243_v21 = vpop.permute.xlu0 %242 }
 0x12b   : > { %v232_v19 = vpop.permute.xlu1 %231 }
 0x12c   : > { %v233_v20 = vsel %vm227_vm4, %v232_v19, %v223_v12 }
 0x12d   : > { %v245_v22 = vadd.f32 %v243_v21, %v233_v20 }
 0x12f   : > { %v238_v23 = vpop.permute.xlu1 %237 }
 0x130   : > { %v239_v24 = vsel %vm227_vm4, %v238_v23, %v226_v13 }
 0x131   : > { %v246_v25 = vadd.f32 %v245_v22, %v239_v24  ;;  %v247_v26 = vsub.f32 %v233_v20, %v239_v24 }
 0x133   : > { %272 = vrot.lane.b32.xlu1 %v247_v26, %s713_s3  ;;  %249 = vrot.lane.b32.xlu0 %v246_v25, %s713_s3  ;;  %v291_v33 = vmul.f32 2.0, %v247_v26 }
 0x1a5   : > { %v273_v27 = vpop.permute.xlu1 %272  ;;  %v250_v28 = vpop.permute.xlu0 %249 }
 0x1a6   : > { %275 = vrot.lane.b32.xlu1 %v273_v27, %s711_s21  ;;  %252 = vrot.lane.b32.xlu0 %v250_v28, %s711_s21 }
 0x218   : > { %v276_v29 = vpop.permute.xlu1 %275  ;;  %v253_v30 = vpop.permute.xlu0 %252 }
 0x219   : > { %v277_v31 = vsel %vm227_vm4, %v276_v29, %v273_v27  ;;  %v254_v32 = vsel %vm227_vm4, %v253_v30, %v250_v28 }
 0x21a   : > { %278 = vrot.lane.b32.xlu1 %v277_v31, %s711_s21  ;;  %255 = vrot.lane.b32.xlu0 %v254_v32, %s711_s21  ;;  %s598_s21 = scalar_lea.vmem %s597_s15, 768 }
 0x21b   : > { %p600_p13 = scmp.lt.s32.totalorder %s598_s21, %s592_s7 }
 0x21d   : > { %p601_p2 = por %p600_p13, %p599_p5 }
 0x21e   : > { %293 = vrot.lane.b32.xlu0 %v291_v33, %s713_s3 }
 0x21f   : > { %p602_p4 = pnand %p601_p2, %p595_p0 }
 0x28c   : > { %v279_v34 = vpop.permute.xlu1 %278  ;;  %v256_v35 = vpop.permute.xlu0 %255 }
 0x28d   : > { %v280_v36 = vsel %vm227_vm4, %v279_v34, %v273_v27  ;;  %v257_v37 = vsel %vm227_vm4, %v256_v35, %v250_v28 }
 0x28e   : > { %282 = vrot.lane.b32.xlu1 %v280_v36, %s714_s5  ;;  %267 = vrot.lane.b32.xlu0 %v257_v37, %s715_s6 }
 0x290   : > { %v294_v38 = vpop.permute.xlu0 %293 }
 0x292   : > { %261 = vrot.lane.b32.xlu1 %v257_v37, %s714_s5 }
 0x296   : > { %286 = vrot.lane.b32.xlu1 %v280_v36, %s715_s6 }
 0x300   : > { %v283_v39 = vpop.permute.xlu1 %282  ;;  %v268_v41 = vpop.permute.xlu0 %267 }
 0x301   : > { %v285_v43 = vsel %vm208_vm9, 0.0, %v283_v39  ;;  %v270_v44 = vsel %vm884_vm10, 0.0, %v268_v41 }
 0x302   : > { %v296_v47 = vadd.f32 %v294_v38, %v285_v43 }
 0x304   : > { %v262_v42 = vpop.permute.xlu1 %261 }
 0x305   : > { %v264_v45 = vsel %vm208_vm9, 0.0, %v262_v42 }
 0x306   : > { %v290_v46 = vsub.f32 %v264_v45, %v270_v44 }
 0x308   : > { %299 = vst.msk [vmem:[%s184_s16] sm:$0xff] %vm298_vm11, %v290_v46  ;;  %473 = vst.msk [vmem:[%s184_s16 + $0x8] sm:$0xff] %vm298_vm11, %v290_v46  ;;  %v287_v48 = vpop.permute.xlu1 %286 }
 0x309   : > { %475 = vst.msk [vmem:[%s184_s16 + $0x10] sm:$0xff] %vm298_vm11, %v290_v46  ;;  %v289_v49 = vsel %vm884_vm10, 0.0, %v287_v48 }
 0x30a   : > { %605 = shalt.err (!%p602_p4)
}
 0x30b   : > { %s606_s28 = scalar_lea.hbm %s901_s29, 384  ;;  %s610_s6 = scalar_lea.hbm %s1001_s1, 768 }
 0x30c   : > { %p607_p6 = scmp.ne.s32.totalorder %s901_s29, %s606_s28  ;;  %p611_p12 = scmp.lt.u32.totalorder %s901_s29, %s1001_s1 }
 0x30d   : > { %p612_p1 = scmp.lt.u32.totalorder %s610_s6, %s606_s28  ;;  %p614_p8 = scmp.lt.u32.totalorder %s606_s28, %s901_s29 }
 0x30e   : > { %p608_p7 = pnand %p607_p6, %p1012_p9 }
 0x30f   : > { %p613_p3 = por %p612_p1, %p611_p12 }
 0x310   : > { %p609_p10 = pneg %p608_p7 }
 0x311   : > { %p615_p11 = por %p614_p8, %p613_p3 }
 0x313   : > { %p616_p0 = pnand %p615_p11, %p609_p10 }
 0x315   : > { %619 = shalt.err (!%p616_p0)
}
 0x316   : > { %s717_s27 = smov 128   ;;  %s718_s7 = smov 8   ;;  %v297_v50 = vadd.f32 %v296_v47, %v289_v49 }
 0x317   : > { %488 = dma.vmem_to_hbm [thread:$0]  (%p1012_p9), %s888_s18, 384, %s901_s29, %s310_s30, %s717_s27, %s717_s27, %s718_s7  }
 0x318   : > { %s942_s21 = scalar_lea.hbm %s1002_s2, %s484_s19  ;;  %300 = vst.msk [vmem:[%s891_s20] sm:$0xff] %vm298_vm11, %v297_v50  ;;  %474 = vst.msk [vmem:[%s891_s20 + $0x8] sm:$0xff] %vm298_vm11, %v297_v50  ;;  %s315_s28 = scalar_lea.sflag [#allocation7], %s847_s4 }
 0x319   : > { %476 = vst.msk [vmem:[%s891_s20 + $0x10] sm:$0xff] %vm298_vm11, %v297_v50  ;;  %s620_s3 = scalar_lea.vmem %s906_s25, 384  ;;  %s719_s18 = smov [#allocation6]  }
 0x31a   : > { %p621_p5 = scmp.ne.s32.totalorder %s906_s25, %s620_s3  ;;  %s624_s29 = sshll.u32 %s719_s18, 4  ;;  %s625_s29 = int_to_ptr.vmem [resolvable:$false] %s624_s29 }
 0x31b   : > { %s626_s12 = scalar_lea.vmem %s625_s29, 768  ;;  %p627_p4 = scmp.lt.s32.totalorder %s906_s25, %s625_s29 }
 0x31c   : > { %p622_p13 = pnand %p621_p5, %p1012_p9  ;;  %p628_p6 = scmp.lt.s32.totalorder %s626_s12, %s620_s3 }
 0x31e   : > { %p623_p2 = pneg %p622_p13  ;;  %p629_p7 = por %p628_p6, %p627_p4 }
 0x320   : > { %p630_p10 = pnand %p629_p7, %p623_p2 }
 0x322   : > { %633 = shalt.err (!%p630_p10)
}
 0x323   : > { %s634_s19 = scalar_lea.hbm %s942_s21, 384  ;;  %s638_s5 = scalar_lea.hbm %s1002_s2, 768 }
 0x324   : > { %p635_p12 = scmp.ne.s32.totalorder %s942_s21, %s634_s19  ;;  %p639_p8 = scmp.lt.u32.totalorder %s942_s21, %s1002_s2 }
 0x325   : > { %p640_p11 = scmp.lt.u32.totalorder %s638_s5, %s634_s19  ;;  %p642_p5 = scmp.lt.u32.totalorder %s634_s19, %s942_s21 }
 0x326   : > { %p636_p1 = pnand %p635_p12, %p1012_p9 }
 0x327   : > { %p641_p0 = por %p640_p11, %p639_p8 }
 0x328   : > { %p637_p3 = pneg %p636_p1 }
 0x329   : > { %p643_p13 = por %p642_p5, %p641_p0 }
 0x32b   : > { %p644_p2 = pnand %p643_p13, %p637_p3 }
 0x32d   : > { %647 = shalt.err (!%p644_p2)
}
 0x32e   : > { %489 = dma.vmem_to_hbm [thread:$0]  (%p1012_p9), %s906_s25, 384, %s942_s21, %s315_s28, %s717_s27, %s717_s27, %s718_s7  }
 0x32f PF: > { %s361_s26 = sand.u32 1, %s686_s9   ;;  %p1013_p4 = scmp.ne.s32.totalorder %s1007_s24, 0 }
 0x330   : > { %p1014_p6 = scmp.ge.s32.totalorder %s706_s14, 2  ;;  %s362_s8 = scalar_lea.sflag [#allocation4], %s361_s26 }
 0x332   : > { %p497_p7 = pnand %p1014_p6, %p1013_p4 }
 0x334   : > { %677 = dma.done.wait (!%p497_p7), %s362_s8, 384  }
 0x335   : > { %679 = vsyncadd (!%p497_p7), %s362_s8, 4294966912  ;;  %s371_s22 = scalar_lea.sflag [#allocation7], %s361_s26 }
 0x336   : > { %681 = dma.done.wait (!%p497_p7), %s371_s22, 384  }
 0x337   : > { %683 = vsyncadd (!%p497_p7), %s371_s22, 4294966912  ;;  %s22_s14 = sadd.s32 1, %s706_s14   ;;  %s1015_s9 = smov %s690_s10 }
 0x338   : > { %p19_p10 = scmp.ge.s32.totalorder %s22_s14, 4   ;;  %s1016_s10 = smov %s694_s11 }
 0x339   : > { %s1017_s11 = smov %s791_s23  ;;  %s1018_s12 = smov %s702_s13 }
 0x33a   : > { %s1019_s13 = smov %s1021_s17  ;;  %21 = sbr.rel (!%p19_p10) target bundleno = 8 (0x8), region = 92 }
 0x341   :  { %376 = vsyncpa [#allocation3], 1 }
 0x342   :  { %378 = vsyncpa [#allocation3 + $0x1], 1 }
 0x343   :  { %379 = vsyncpa [#allocation4], 1 }
 0x344   :  { %381 = vsyncpa [#allocation4 + $0x1], 1 }
 0x345   :  { %382 = vsyncpa [#allocation7], 1 }
 0x346   :  { %384 = vsyncpa [#allocation7 + $0x1], 1 }

</bundles_post_ra>
